<compile_context>
chip_gen: v7x
topology: tpu7x:2x2x1
jax: 0.10.0
libtpu: 0.0.40
codegen_flags: <defaults>
</compile_context>

<pallas_src>
import functools

import numpy as np
import jax
import jax.numpy as jnp
from jax.experimental import pallas as pl
from jax.experimental.pallas import tpu as pltpu


# ----------------------------------------------------------------------------
# helpers (static, shape-driven planning)
# ----------------------------------------------------------------------------
def _pad_amounts(diff):
    """(left, right) pad like the reference: ceil(diff/2), floor(diff/2)."""
    return int(np.ceil(diff / 2)), int(np.floor(diff / 2))


def _kept_range(c, C):
    """For an un-padded width-`c` input centred-padded/cropped to width C:
    returns (col_start, col_end) of the surviving input columns and
    (w_start, w_end) rows of W those columns line up with."""
    lo, hi = _pad_amounts(C - c)
    col_s = max(0, -lo)
    col_e = c + min(0, hi)
    return col_s, col_e, col_s + lo, col_e + lo


# ----------------------------------------------------------------------------
# Pallas kernel: combine + Linear + activation on one (TM, *) row tile
# ----------------------------------------------------------------------------
def _candidate_op_kernel(*refs, combiner, activation, n_inputs, n_weights,
                         mm_dtype):
    x_refs = refs[:n_inputs]
    w_refs = refs[n_inputs:n_inputs + n_weights]
    b_ref = refs[n_inputs + n_weights]
    o_ref = refs[n_inputs + n_weights + 1]

    bv = b_ref[...]                                   # (1, Hp) f32, resident

    if n_inputs == 0:
        # every channel was cropped away -> combined tensor is all zeros
        y = jnp.broadcast_to(bv, o_ref.shape)
    elif combiner == "mul":
        # padded lanes are zero -> the product is nonzero only on the channel
        # intersection; matmul that slab against the matching rows of W.
        prod = x_refs[0][...]
        for xr in x_refs[1:]:
            prod = prod * xr[...]                     # f32 elementwise (VPU)
        y = jnp.dot(prod.astype(mm_dtype), w_refs[0][...],
                    preferred_element_type=jnp.float32) + bv
    else:  # 'add', 'concat', or a single (non-list) input
        # zero-padding an input and multiplying by full W == multiplying the
        # un-padded input by the matching row-slice of W; sum partial products.
        acc = None
        for xr, wr in zip(x_refs, w_refs):
            part = jnp.dot(xr[...].astype(mm_dtype), wr[...],
                           preferred_element_type=jnp.float32)
            acc = part if acc is None else acc + part
        y = acc + bv

    if activation == "relu":
        y = jnp.maximum(y, 0.0)
    # 'id' -> no-op
    o_ref[...] = y.astype(o_ref.dtype)


# ----------------------------------------------------------------------------
# wrapper: static combine plan + tiled pallas_call
# ----------------------------------------------------------------------------
def candidate_operation(X, w, b, *, combiner, input_channels, activation="relu",
                        tile_m=512, matmul_dtype=jnp.bfloat16):
    assert combiner in ("add", "concat", "mul")
    assert activation in ("relu", "id")

    is_list = isinstance(X, (list, tuple))
    xs_in = list(X) if is_list else [X]
    C = int(input_channels)
    assert int(w.shape[0]) == C, "weight rows must equal input_channels"

    lead = tuple(xs_in[0].shape[:-1])
    m = int(np.prod(lead)) if lead else 1
    xs2d = [jnp.asarray(x, jnp.float32).reshape(m, int(x.shape[-1]))
            for x in xs_in]

    # ---- static combine plan: per-input kept columns + W row ranges ---------
    xs_kept, w_rows = [], []
    if (not is_list) or combiner == "add":
        for x in xs2d:
            cs, ce, ws, we = _kept_range(x.shape[1], C)
            if ce <= cs:                              # fully cropped away
                continue
            xs_kept.append(x if (cs == 0 and ce == x.shape[1]) else x[:, cs:ce])
            w_rows.append((ws, we))
    elif combiner == "mul":
        spans = [_kept_range(x.shape[1], C) for x in xs2d]
        L = max(s[2] for s in spans)                  # intersection of W rows
        R = min(s[3] for s in spans)
        if R > L:
            for x, (cs, ce, ws, we) in zip(xs2d, spans):
                a, bnd = L - ws + cs, R - ws + cs     # intersection in x cols
                xs_kept.append(x if (a == 0 and bnd == x.shape[1])
                               else x[:, a:bnd])
            w_rows = [(L, R)]
    else:  # 'concat' of a list: pad/crop the concatenated tensor
        widths = [x.shape[1] for x in xs2d]
        offs = np.concatenate([[0], np.cumsum(widths)[:-1]]).astype(int)
        lo, _hi = _pad_amounts(C - int(np.sum(widths)))
        for x, off in zip(xs2d, offs):
            c = x.shape[1]
            a = max(0, lo + int(off))
            bnd = min(C, lo + int(off) + c)
            if bnd <= a:                              # fully cropped away
                continue
            cs, ce = a - (lo + int(off)), bnd - (lo + int(off))
            xs_kept.append(x if (cs == 0 and ce == c) else x[:, cs:ce])
            w_rows.append((a, bnd))

    n_inputs, n_weights = len(xs_kept), len(w_rows)

    # ---- lane-dense W / b: pad hidden dim to a multiple of 128 --------------
    h = int(w.shape[1])
    h_pad = max(128, -(-h // 128) * 128)
    w_f32 = jnp.asarray(w, jnp.float32)
    b_row = jnp.asarray(b, jnp.float32).reshape(1, h)
    if h_pad != h:
        w_f32 = jnp.pad(w_f32, ((0, 0), (0, h_pad - h)))
        b_row = jnp.pad(b_row, ((0, 0), (0, h_pad - h)))
    w_ops = [w_f32[ws:we, :].astype(matmul_dtype) for ws, we in w_rows]

    # ---- M tiling: auto double-buffered pipeline over the row axis ----------
    tile_m = max(8, (int(tile_m) // 8) * 8)
    TM = tile_m if m >= tile_m else m
    n_tiles = pl.cdiv(m, TM)
    m_pad = n_tiles * TM
    if m_pad != m:                                    # rare: pad last tile rows
        xs_kept = [jnp.pad(x, ((0, m_pad - m), (0, 0))) for x in xs_kept]

    kernel = functools.partial(_candidate_op_kernel, combiner=combiner,
                               activation=activation, n_inputs=n_inputs,
                               n_weights=n_weights, mm_dtype=matmul_dtype)

    in_specs = ([pl.BlockSpec((TM, x.shape[1]), lambda i: (i, 0))
                 for x in xs_kept]                                  # tiled rows
                + [pl.BlockSpec(tuple(wi.shape), lambda i: (0, 0))
                   for wi in w_ops]                                 # resident W
                + [pl.BlockSpec((1, h_pad), lambda i: (0, 0))])     # resident b

    out = pl.pallas_call(
        kernel,
        out_shape=jax.ShapeDtypeStruct((m_pad, h_pad), jnp.float32),
        grid=(n_tiles,),
        in_specs=in_specs,
        out_specs=pl.BlockSpec((TM, h_pad), lambda i: (i, 0)),
        compiler_params=pltpu.CompilerParams(
            dimension_semantics=("parallel",)),
    )(*xs_kept, *w_ops, b_row)

    if m_pad != m or h_pad != h:
        out = out[:m, :h]
    return out.reshape(*lead, h)


# ----------------------------------------------------------------------------
# pure-JAX reference (mirrors the PyTorch module) for correctness checking
# ----------------------------------------------------------------------------
def _reference(X, w, b, combiner, C, activation):
    def pad1(x):
        diff = C - x.shape[-1]
        lo, hi = _pad_amounts(diff)
        if diff >= 0:
            cfg = [(0, 0)] * (x.ndim - 1) + [(lo, hi)]
            return jnp.pad(x, cfg)
        return x[..., -lo:x.shape[-1] + hi]

    if isinstance(X, (list, tuple)):
        if combiner == "concat":
            comb = pad1(jnp.concatenate(list(X), axis=-1))
        elif combiner == "add":
            comb = sum(pad1(x) for x in X)
        else:  # mul
            parts = [pad1(x) for x in X]
            comb = parts[0]
            for p in parts[1:]:
                comb = comb * p
    else:
        comb = pad1(X)

    y = jnp.dot(comb.astype(jnp.float32), jnp.asarray(w, jnp.float32))
    y = y + jnp.asarray(b, jnp.float32).reshape(1, -1)
    if activation == "relu":
        y = jnp.maximum(y, 0.0)
    return y


# ----------------------------------------------------------------------------
# Demo / self-test
# ----------------------------------------------------------------------------
if __name__ == "__main__":
    BATCH, SEQ = 2, 8
    INPUT_CHANNELS = 32
    HIDDEN = 128                      # lane-dense hidden dim for the main head

    key = jax.random.PRNGKey(0)
    k1, k2, kw, kb, kw2, kb2 = jax.random.split(key, 6)

    # two candidate inputs with different channel counts (< input_channels)
    x1 = jax.random.normal(k1, (BATCH, SEQ, 20), dtype=jnp.float32)
    x2 = jax.random.normal(k2, (BATCH, SEQ, 24), dtype=jnp.float32)

    # deterministic Linear(input_channels -> hidden) parameters
    w = (jax.random.normal(kw, (INPUT_CHANNELS, HIDDEN), dtype=jnp.float32)
         / np.sqrt(INPUT_CHANNELS))
    b = jax.random.normal(kb, (HIDDEN,), dtype=jnp.float32) * 0.01

    # a small (32-wide) head exercises the H -> 128 lane-padding path
    w_s = (jax.random.normal(kw2, (INPUT_CHANNELS, 32), dtype=jnp.float32)
           / np.sqrt(INPUT_CHANNELS))
    b_s = jax.random.normal(kb2, (32,), dtype=jnp.float32) * 0.01

    cases = [
        # (combiner, inputs, W, b, activation, tile_m)
        ("add",    [x1, x2],                     w,   b,   "relu", 8),    # grid=(2,)
        ("mul",    [x1, x2],                     w,   b,   "relu", 512),
        ("concat", [x1[..., :12], x2[..., :16]], w,   b,   "relu", 512),
        ("add",    x1,                           w_s, b_s, "id",   512),  # single input
    ]

    for comb, xin, ww, bb, act, tm in cases:
        fn = jax.jit(functools.partial(candidate_operation, combiner=comb,
                                       input_channels=INPUT_CHANNELS,
                                       activation=act, tile_m=tm))
        out = fn(xin, ww, bb)
        jax.block_until_ready(out)
        ref = _reference(xin, ww, bb, comb, INPUT_CHANNELS, act)
        assert out.shape == ref.shape, (comb, out.shape, ref.shape)
        np.testing.assert_allclose(np.asarray(out), np.asarray(ref),
                                   rtol=5e-2, atol=2e-1)

    print("KERNEL_OK")
</pallas_src>

<mosaic_0001>
module attributes {stable_mosaic.version = 11 : i64} {
  func.func @_candidate_op_kernel(%arg0: i32, %arg1: memref<8x20xf32, #tpu.memory_space<vmem>>, %arg2: memref<8x24xf32, #tpu.memory_space<vmem>>, %arg3: memref<20x128xbf16, #tpu.memory_space<vmem>>, %arg4: memref<24x128xbf16, #tpu.memory_space<vmem>>, %arg5: memref<1x128xf32, #tpu.memory_space<vmem>>, %arg6: memref<8x128xf32, #tpu.memory_space<vmem>>) attributes {dimension_semantics = [#tpu.dimension_semantics<parallel>], iteration_bounds = array<i64: 2>, scalar_prefetch = 0 : i64, scratch_operands = 0 : i64, tpu.core_type = #tpu.core_type<tc>, window_params = [{transform_indices = @transform_0, window_bounds = array<i64: 8, 20>}, {transform_indices = @transform_1, window_bounds = array<i64: 8, 24>}, {pipeline_mode = #tpu.pipeline_mode<synchronous>, transform_indices = @transform_2, window_bounds = array<i64: 20, 128>}, {pipeline_mode = #tpu.pipeline_mode<synchronous>, transform_indices = @transform_3, window_bounds = array<i64: 24, 128>}, {pipeline_mode = #tpu.pipeline_mode<synchronous>, transform_indices = @transform_4, window_bounds = array<i64: 1, 128>}, {transform_indices = @transform_5, window_bounds = array<i64: 8, 128>}]} {
    %c0 = arith.constant 0 : index
    %c0_0 = arith.constant 0 : index
    %0 = vector.load %arg5[%c0, %c0_0] : memref<1x128xf32, #tpu.memory_space<vmem>>, vector<1x128xf32>
    %c0_1 = arith.constant 0 : index
    %c0_2 = arith.constant 0 : index
    %1 = vector.load %arg1[%c0_1, %c0_2] : memref<8x20xf32, #tpu.memory_space<vmem>>, vector<8x20xf32>
    %2 = arith.truncf %1 : vector<8x20xf32> to vector<8x20xbf16>
    %c0_3 = arith.constant 0 : index
    %c0_4 = arith.constant 0 : index
    %3 = vector.load %arg3[%c0_3, %c0_4] : memref<20x128xbf16, #tpu.memory_space<vmem>>, vector<20x128xbf16>
    %cst = arith.constant dense<0.000000e+00> : vector<8x128xf32>
    %4 = tpu.matmul %2, %3, %cst {dimension_numbers = #tpu.dot_dimension_numbers<[1], [0], [0], [1], [0, 0, 1, 1], [], []>} : vector<8x20xbf16>, vector<20x128xbf16>, vector<8x128xf32> -> vector<8x128xf32>
    %c0_5 = arith.constant 0 : index
    %c0_6 = arith.constant 0 : index
    %5 = vector.load %arg2[%c0_5, %c0_6] : memref<8x24xf32, #tpu.memory_space<vmem>>, vector<8x24xf32>
    %6 = arith.truncf %5 : vector<8x24xf32> to vector<8x24xbf16>
    %c0_7 = arith.constant 0 : index
    %c0_8 = arith.constant 0 : index
    %7 = vector.load %arg4[%c0_7, %c0_8] : memref<24x128xbf16, #tpu.memory_space<vmem>>, vector<24x128xbf16>
    %cst_9 = arith.constant dense<0.000000e+00> : vector<8x128xf32>
    %8 = tpu.matmul %6, %7, %cst_9 {dimension_numbers = #tpu.dot_dimension_numbers<[1], [0], [0], [1], [0, 0, 1, 1], [], []>} : vector<8x24xbf16>, vector<24x128xbf16>, vector<8x128xf32> -> vector<8x128xf32>
    %9 = arith.addf %4, %8 : vector<8x128xf32>
    %10 = vector.broadcast %0 : vector<1x128xf32> to vector<8x128xf32>
    %11 = arith.addf %9, %10 : vector<8x128xf32>
    %cst_10 = arith.constant 0.000000e+00 : f32
    %12 = vector.broadcast %cst_10 : f32 to vector<8x128xf32>
    %13 = arith.maximumf %11, %12 : vector<8x128xf32>
    %c0_11 = arith.constant 0 : index
    %c0_12 = arith.constant 0 : index
    %14 = vector.load %arg6[%c0_11, %c0_12] : memref<8x128xf32, #tpu.memory_space<vmem>>, vector<8x128xf32>
    tpu.vector_store %arg6[%c0_11, %c0_12], %13 {strides = array<i32>} : memref<8x128xf32, #tpu.memory_space<vmem>>, vector<8x128xf32>,
    return
  }
  func.func @transform_0(%arg0: i32) -> (i32, i32) {
    %c0_i32 = arith.constant 0 : i32
    %c0_i32_0 = arith.constant 0 : i32
    return %arg0, %c0_i32 : i32, i32
  }
  func.func @transform_1(%arg0: i32) -> (i32, i32) {
    %c0_i32 = arith.constant 0 : i32
    %c0_i32_0 = arith.constant 0 : i32
    return %arg0, %c0_i32 : i32, i32
  }
  func.func @transform_2(%arg0: i32) -> (i32, i32) {
    %c0_i32 = arith.constant 0 : i32
    %c0_i32_0 = arith.constant 0 : i32
    %c0_i32_1 = arith.constant 0 : i32
    return %c0_i32, %c0_i32_0 : i32, i32
  }
  func.func @transform_3(%arg0: i32) -> (i32, i32) {
    %c0_i32 = arith.constant 0 : i32
    %c0_i32_0 = arith.constant 0 : i32
    %c0_i32_1 = arith.constant 0 : i32
    return %c0_i32, %c0_i32_0 : i32, i32
  }
  func.func @transform_4(%arg0: i32) -> (i32, i32) {
    %c0_i32 = arith.constant 0 : i32
    %c0_i32_0 = arith.constant 0 : i32
    %c0_i32_1 = arith.constant 0 : i32
    return %c0_i32, %c0_i32_0 : i32, i32
  }
  func.func @transform_5(%arg0: i32) -> (i32, i32) {
    %c0_i32 = arith.constant 0 : i32
    %c0_i32_0 = arith.constant 0 : i32
    return %arg0, %c0_i32 : i32, i32
  }
}

</mosaic_0001>

<bundles_post_ra>
// kernel: candidate_operation.1
= control target key start
LH: loop header
LB: loop body
LE: loop exit
PB: predicated region body
PF: predicated region fallthrough
CT: control target
= control target key end

     0   :  { %10 = vsyncpa [#allocation3], 0  ;;  %s757_s0 = inlined_call_operand.vmem [shape: f32[16,20], index: 0, kind: input, shape index: {}]   ;;  %s758_s1 = inlined_call_operand.vmem [shape: f32[16,24], index: 1, kind: input, shape index: {}]   ;;  %s759_s2 = inlined_call_operand.vmem [shape: bf16[20,128], index: 2, kind: input, shape index: {}]   ;;  %s760_s3 = inlined_call_operand.vmem [shape: bf16[24,128], index: 3, kind: input, shape index: {}]   ;;  %s761_s4 = inlined_call_operand.vmem [shape: f32[1,128], index: 4, kind: input, shape index: {}]   ;;  %s762_s5 = inlined_call_operand.hbm [shape: f32[16,128], index: 5, kind: output, shape index: {}]  }
   0x1   :  { %12 = vsyncpa [#allocation3 + $0x1], 0  ;;  %s639_s18 = smov 0   ;;  %s641_s19 = smov 0  }
   0x2   :  { %s643_s20 = smov 0   ;;  %s645_s21 = smov 0  }
   0x3 LB: > { %s660_s22 = sadd.s32 4294967295, %s604_s21   ;;  %s457_s23 = sadd.s32 4294967294, %s604_s21   ;;  %s604_s21 = sphi %s645_s21, %s768_s21   ;;  %s600_s20 = sphi %s643_s20, %s767_s20   ;;  %s596_s19 = sphi %s641_s19, %s766_s19   ;;  %s592_s18 = sphi %s639_s18, %s765_s18  }
   0x4   : > { %s664_s24 = sadd.s32 1, %s604_s21   ;;  %s140_s25 = sadd.s32 1, %s600_s20 }
   0x5   : > { %s137_s26 = ssub.s32 %s604_s21, %s664_s24  ;;  %p150_p0 = scmp.ne.s32.totalorder %s600_s20, %s596_s19 }
   0x6   : > { %p138_p1 = scmp.eq.s32.totalorder %s137_s26, 0  ;;  %p151_p2 = scmp.eq.s32.totalorder %s660_s22, 1 }
   0x7   : > { %p156_p3 = scmp.ne.s32.totalorder %s596_s19, %s592_s18  ;;  %p157_p4 = scmp.eq.s32.totalorder %s457_s23, 1 }
   0x8   : > { %s675_s27 = scalar_select %p138_p1, %s600_s20, %s140_s25  }
   0x9   : > { %p677_p5 = por %p151_p2, %p150_p0  ;;  %p681_p6 = por %p157_p4, %p156_p3 }
   0xa   : > { %p460_p7 = scmp.ge.s32.totalorder %s604_s21, 1  ;;  %p198_p8 = scmp.lt.s32.totalorder %s604_s21, 3 }
   0xc   : > { %p199_p9 = pnand %p460_p7, %p198_p8 }
   0xd   : > { %v538_v0 = vld [vmem:[%s760_s3] sm:$0xff] (!%p199_p9)   ;;  %v606_v1 = vmov (!%p199_p9), 0.0   ;;  %vm262_vm0 = vcmask (!%p199_p9), 1043456   ;;  %v540_v3 = vld [vmem:[%s760_s3 + $0x8] ss:$0 sps:$4 sm:$0xff] (!%p199_p9)   ;;  %vm319_vm1 = vcmask (!%p199_p9), 1041408  }
   0xe   : > { %202 = sbr.rel (%p199_p9) target bundleno = 261 (0x105), region = 40  ;;  %481 = vmatprep.subr.bf16.mxu0 (!%p199_p9), %v606_v1  ;;  %489 = vmatprep.subr.bf16.mxu1 (!%p199_p9), %v606_v1  ;;  %v539_v2 = vld [vmem:[%s759_s2] sm:$0xff] (!%p199_p9)   ;;  %v541_v4 = vld [vmem:[%s759_s2 + $0x8] ss:$0 sps:$4 sm:$0x33] (!%p199_p9)   ;;  %p229_p10 = scmp.lt.s32.totalorder (!%p199_p9), %s660_s22, 1 }
   0xf   : > { %482 = vmatpush3.bf16.msra.mxu0 (!%p199_p9), %v538_v0  ;;  %490 = vmatpush3.bf16.msra.mxu1 (!%p199_p9), %v539_v2  ;;  %v264_v5 = vsel (!%p199_p9), %vm262_vm0, %v540_v3, 0  ;;  %vm607_vm2 = vmmov (!%p199_p9), 0   ;;  %v321_v6 = vsel (!%p199_p9), %vm319_vm1, %v541_v4, 0  ;;  %vm258_vm3 = vcmask (!%p199_p9), 195584   ;;  %s226_s30 = sand.u32 (!%p199_p9), 1, %s596_s19   ;;  %s472_s9 = sshll.u32 (!%p199_p9), %s660_s22, 7 }
  0x10   : > { %483 = vmatprep.subr.bf16.mxu0 (!%p199_p9), %v606_v1  ;;  %491 = vmatprep.subr.bf16.mxu1 (!%p199_p9), %v606_v1  ;;  %vm315_vm4 = vcmask (!%p199_p9), 162816   ;;  %s461_s6 = sshll.u32 (!%p199_p9), %s226_s30, 3  ;;  %v470_v12 = vld [vmem:[%s761_s4] ss:$0 sm:$0xff] (!%p199_p9)  ;;  %s373_s15 = scalar_lea.sflag (!%p199_p9), [#allocation3], %s226_s30 }
  0x11   : > { %485 = vmatprep.mubr.msk.bf16.mxu0 (!%p199_p9), %vm607_vm2, %v606_v1  ;;  %493 = vmatprep.mubr.msk.bf16.mxu1 (!%p199_p9), %vm607_vm2, %v606_v1  ;;  %s228_s10 = scalar_lea.vmem (!%p199_p9), [#allocation2], %s461_s6 }
  0x12   : > { %s386_s11 = sshll.u32 (!%p199_p9), %s228_s10, 4  ;;  %s717_s11 = int_to_ptr.vmem [resolvable:$true] %s386_s11 }
  0x13   : > { %484 = vmatpush3.bf16.msra.mxu0 (!%p199_p9), %v264_v5  ;;  %492 = vmatpush3.bf16.msra.mxu1 (!%p199_p9), %v321_v6  ;;  %s542_s16 = scalar_lea.vmem (!%p199_p9), %s717_s11, 128 }
  0x14   : > { %p543_p11 = scmp.ne.s32.totalorder (!%p199_p9), %s717_s11, %s542_s16 }
  0x15   : > { %s230_s13 = scalar_select %p229_p10, %s660_s22, 1 }
  0x16   : > { %p544_p12 = pnand %p543_p11, %p677_p5  ;;  %s608_s22 = smov [#allocation2]  }
  0x17   : > { %s462_s14 = sshll.u32 %s230_s13, 3 }
  0x18   : > { %s236_s17 = scalar_lea.vmem %s758_s1, %s462_s14  ;;  %s232_s26 = scalar_lea.vmem %s757_s0, %s462_s14 }
  0x19   : > { %v244_v7 = vld [vmem:[%s236_s17] sm:$0xff]  ;;  %s715_s14 = scalar_lea.hbm %s762_s5, %s472_s9  ;;  %p545_p13 = pneg %p544_p12 }
  0x1a   : > { %v239_v8 = vld [vmem:[%s232_s26] sm:$0xff]  ;;  %v245_v9 = vpack.c.bf16 %v244_v7, %v244_v7  ;;  %s546_s17 = sshll.u32 %s608_s22, 4  ;;  %s547_s17 = int_to_ptr.vmem [resolvable:$false] %s546_s17 }
  0x1b   : > { %v240_v10 = vpack.c.bf16 %v239_v8, %v239_v8  ;;  %s548_s23 = scalar_lea.vmem %s547_s17, 256  ;;  %p549_p0 = scmp.lt.s32.totalorder %s717_s11, %s547_s17 }
  0x1c   : > { %486 = vmatmul.mubr.msk.bf16.vlgmr.msra.gmra.mrb[0].mxu0 %vm258_vm3, %v245_v9  ;;  %p550_p1 = scmp.lt.s32.totalorder %s548_s23, %s542_s16 }
  0x1d   : > { %494 = vmatmul.mubr.msk.bf16.vlgmr.msra.gmra.mrb[0].mxu1 %vm315_vm4, %v240_v10 }
  0x1e   : > { %p551_p2 = por %p550_p1, %p549_p0 }
  0x20   : > { %p552_p3 = pnand %p551_p2, %p545_p13 }
  0xef   : > { %v300_v11 = vpop.f32.mrb[0].mxu0 }
  0xf0   : > { %v357_v13 = vpop.f32.mrb[0].mxu1  ;;  %v487_v15 = vpop.f32.mrb[1].mxu0 }
  0xf1   : > { %v358_v14 = vadd.f32 %v357_v13, %v300_v11  ;;  %v495_v16 = vpop.f32.mrb[1].mxu1  ;;  %v303_v17 = vpop.f32.mrb[2].mxu0 }
  0xf2   : > { %v360_v18 = vpop.f32.mrb[2].mxu1  ;;  %v488_v20 = vpop.f32.mrb[3].mxu0 }
  0xf3   : > { %v369_v19 = vadd.f32 %v470_v12, %v358_v14  ;;  %v496_v21 = vpop.f32.mrb[3].mxu1 }
  0xf5   : > { %v370_v22 = vmax.f32 %v369_v19, 0.0 }
  0xf7   : > { %371 = vst [vmem:[%s228_s10] sm:$0xff] %v370_v22 }
  0xf8   : > { %555 = shalt.err (!%p552_p3)
}
  0xf9   : > { %s556_s25 = scalar_lea.hbm %s715_s14, 128  ;;  %s560_s6 = scalar_lea.hbm %s762_s5, 256 }
  0xfa   : > { %p557_p4 = scmp.ne.s32.totalorder %s715_s14, %s556_s25  ;;  %p561_p9 = scmp.lt.u32.totalorder %s715_s14, %s762_s5 }
  0xfb   : > { %p562_p10 = scmp.lt.u32.totalorder %s560_s6, %s556_s25  ;;  %p564_p12 = scmp.lt.u32.totalorder %s556_s25, %s715_s14 }
  0xfc   : > { %p558_p7 = pnand %p557_p4, %p677_p5 }
  0xfd   : > { %p563_p11 = por %p562_p10, %p561_p9 }
  0xfe   : > { %p559_p8 = pneg %p558_p7 }
  0xff   : > { %p565_p13 = por %p564_p12, %p563_p11 }
 0x101   : > { %p566_p0 = pnand %p565_p13, %p559_p8 }
 0x103   : > { %569 = shalt.err (!%p566_p0)
}
 0x104   : > { %497 = dma.vmem_to_hbm [thread:$0]  (%p677_p5), %s717_s11, 128, %s715_s14, %s373_s15  }
 0x105 PF: > { %p503_p1 = scmp.ge.s32.totalorder %s604_s21, 2  ;;  %s398_s9 = sand.u32 1, %s592_s18  }
 0x106   : > { %s399_s10 = scalar_lea.sflag [#allocation3], %s398_s9 }
 0x107   : > { %p500_p2 = pnand %p503_p1, %p681_p6 }
 0x109   : > { %587 = dma.done.wait (!%p500_p2), %s399_s10, 128  }
 0x10a   : > { %589 = vsyncadd (!%p500_p2), %s399_s10, 4294967168  ;;  %p15_p3 = scmp.ge.s32.totalorder %s664_s24, 4   ;;  %s765_s18 = smov %s596_s19 }
 0x10b   : > { %s766_s19 = smov %s600_s20  ;;  %s767_s20 = smov %s675_s27 }
 0x10c   : > { %s768_s21 = smov %s664_s24  ;;  %17 = sbr.rel (!%p15_p3) target bundleno = 3 (0x3), region = 78 }
 0x113   :  { %404 = vsyncpa [#allocation3], 1 }
 0x114   :  { %406 = vsyncpa [#allocation3 + $0x1], 1 }

</bundles_post_ra>
